<compile_context>
chip_gen: v5e
topology: v5e:2x2
jax: 0.10.0
libtpu: 0.0.40
codegen_flags: <defaults>
</compile_context>

<pallas_src>
import jax
import jax.numpy as jnp
from jax.experimental import pallas as pl
from jax.experimental.pallas import tpu as pltpu


def _round_up(x: int, m: int) -> int:
    return ((x + m - 1) // m) * m


def _make_avg_corr_kernel(n_true: int, eps: float):
    inv_n = 1.0 / float(n_true)

    def kernel(o_ref, t_ref, corr_ref, s_o, s_t, s_oo, s_tt, s_ot):
        ni = pl.program_id(1)

        @pl.when(ni == 0)
        def _init():
            s_o[...] = jnp.zeros_like(s_o)
            s_t[...] = jnp.zeros_like(s_t)
            s_oo[...] = jnp.zeros_like(s_oo)
            s_tt[...] = jnp.zeros_like(s_tt)
            s_ot[...] = jnp.zeros_like(s_ot)

        o = o_ref[...].astype(jnp.float32)   # (bn, bf)
        t = t_ref[...].astype(jnp.float32)   # (bn, bf)

        # single-pass moment accumulation over the batch axis
        # (zero-padded rows contribute nothing to these sums)
        s_o[...] += jnp.sum(o, axis=0, keepdims=True)
        s_t[...] += jnp.sum(t, axis=0, keepdims=True)
        s_oo[...] += jnp.sum(o * o, axis=0, keepdims=True)
        s_tt[...] += jnp.sum(t * t, axis=0, keepdims=True)
        s_ot[...] += jnp.sum(o * t, axis=0, keepdims=True)

        @pl.when(ni == pl.num_programs(1) - 1)
        def _finalize():
            mean_o = s_o[...] * inv_n
            mean_t = s_t[...] * inv_n
            var_o = s_oo[...] * inv_n - mean_o * mean_o
            var_t = s_tt[...] * inv_n - mean_t * mean_t
            cov = s_ot[...] * inv_n - mean_o * mean_t
            # TODO(synk): one-pass moments lose precision if |mean| >> std;
            # pre-subtract a per-feature shift in the wrapper for such inputs.
            corr_ref[...] = cov * jax.lax.rsqrt((var_o + eps) * (var_t + eps))

    return kernel


def avg_corr(output: jax.Array, target: jax.Array, eps: float = 1e-12,
             block_n: int = 512, block_f: int = 512) -> jax.Array:
    """Pallas TPU implementation of AvgCorr.forward(output, target)."""
    assert output.shape == target.shape and output.ndim == 2
    n, f = output.shape

    # tile sizes respecting the (8, 128) layout constraint
    bn = min(block_n, _round_up(n, 8))
    bf = min(block_f, _round_up(f, 128))
    n_pad = _round_up(n, bn)
    f_pad = _round_up(f, bf)

    if (n_pad, f_pad) != (n, f):
        output = jnp.pad(output, ((0, n_pad - n), (0, f_pad - f)))
        target = jnp.pad(target, ((0, n_pad - n), (0, f_pad - f)))

    grid = (f_pad // bf, n_pad // bn)   # F tiles (parallel), N tiles (reduction)
    kernel = _make_avg_corr_kernel(n_true=n, eps=eps)

    corrs = pl.pallas_call(
        kernel,
        out_shape=jax.ShapeDtypeStruct((1, f_pad), jnp.float32),
        grid_spec=pltpu.PrefetchScalarGridSpec(
            num_scalar_prefetch=0,
            grid=grid,
            in_specs=[
                pl.BlockSpec((bn, bf), lambda fi, ni: (ni, fi)),
                pl.BlockSpec((bn, bf), lambda fi, ni: (ni, fi)),
            ],
            out_specs=pl.BlockSpec((1, bf), lambda fi, ni: (0, fi)),
            scratch_shapes=[pltpu.VMEM((1, bf), jnp.float32) for _ in range(5)],
        ),
        compiler_params=pltpu.CompilerParams(
            dimension_semantics=("parallel", "arbitrary")),
    )(output, target)

    # final (tiny) mean over the true feature count, padded lanes sliced away
    return -jnp.mean(corrs[0, :f])


def _reference_avg_corr(output, target, eps=1e-12):
    # pure-JAX reference mirroring the PyTorch module
    delta_out = output - output.mean(0, keepdims=True)
    delta_target = target - target.mean(0, keepdims=True)
    var_out = (delta_out ** 2).mean(0, keepdims=True)
    var_target = (delta_target ** 2).mean(0, keepdims=True)
    corrs = (delta_out * delta_target).mean(0, keepdims=True) / jnp.sqrt(
        (var_out + eps) * (var_target + eps)
    )
    return -corrs.mean()


if __name__ == "__main__":
    key = jax.random.PRNGKey(0)
    k1, k2, k3, k4 = jax.random.split(key, 4)

    # case 1: non-aligned shapes -> exercises zero-padding of N and F
    N1, F1 = 12, 200
    out1 = jax.random.normal(k1, (N1, F1), dtype=jnp.float32)
    tgt1 = jax.random.normal(k2, (N1, F1), dtype=jnp.float32)
    res1 = avg_corr(out1, tgt1)
    jax.block_until_ready(res1)
    ref1 = _reference_avg_corr(out1, tgt1)
    assert jnp.allclose(res1, ref1, atol=2e-5, rtol=1e-5), (res1, ref1)

    # case 2: small tiles -> exercises the multi-tile grid (2 F-tiles x 2 N-tiles)
    # with scratch accumulation across the reduction axis
    N2, F2 = 16, 256
    out2 = jax.random.normal(k3, (N2, F2), dtype=jnp.float32)
    tgt2 = jax.random.normal(k4, (N2, F2), dtype=jnp.float32)
    res2 = avg_corr(out2, tgt2, block_n=8, block_f=128)
    jax.block_until_ready(res2)
    ref2 = _reference_avg_corr(out2, tgt2)
    assert jnp.allclose(res2, ref2, atol=2e-5, rtol=1e-5), (res2, ref2)

    print("KERNEL_OK")
</pallas_src>

<mosaic_0001>
module attributes {stable_mosaic.version = 11 : i64} {
  func.func @kernel(%arg0: i32, %arg1: i32, %arg2: memref<16x256xf32, #tpu.memory_space<vmem>>, %arg3: memref<16x256xf32, #tpu.memory_space<vmem>>, %arg4: memref<1x256xf32, #tpu.memory_space<vmem>>, %arg5: memref<1x256xf32, #tpu.memory_space<vmem>>, %arg6: memref<1x256xf32, #tpu.memory_space<vmem>>, %arg7: memref<1x256xf32, #tpu.memory_space<vmem>>, %arg8: memref<1x256xf32, #tpu.memory_space<vmem>>, %arg9: memref<1x256xf32, #tpu.memory_space<vmem>>) attributes {dimension_semantics = [#tpu.dimension_semantics<parallel>, #tpu.dimension_semantics<arbitrary>], iteration_bounds = array<i64: 1, 1>, scalar_prefetch = 0 : i64, scratch_operands = 5 : i64, tpu.core_type = #tpu.core_type<tc>, window_params = [{transform_indices = @transform_0, window_bounds = array<i64: 16, 256>}, {transform_indices = @transform_1, window_bounds = array<i64: 16, 256>}, {transform_indices = @transform_2, window_bounds = array<i64: 1, 256>}]} {
    %c0_i32 = arith.constant 0 : i32
    %0 = arith.cmpi eq, %arg1, %c0_i32 : i32
    %1 = arith.extui %0 : i1 to i32
    %c0_i32_0 = arith.constant 0 : i32
    %2 = arith.cmpi ne, %1, %c0_i32_0 : i32
    scf.if %2 {
      %cst_30 = arith.constant 0.000000e+00 : f32
      %36 = vector.broadcast %cst_30 : f32 to vector<1x256xf32>
      %c0_31 = arith.constant 0 : index
      %c0_32 = arith.constant 0 : index
      %37 = vector.load %arg5[%c0_31, %c0_32] : memref<1x256xf32, #tpu.memory_space<vmem>>, vector<1x256xf32>
      tpu.vector_store %arg5[%c0_31, %c0_32], %36 {strides = array<i32>} : memref<1x256xf32, #tpu.memory_space<vmem>>, vector<1x256xf32>,
      %cst_33 = arith.constant 0.000000e+00 : f32
      %38 = vector.broadcast %cst_33 : f32 to vector<1x256xf32>
      %c0_34 = arith.constant 0 : index
      %c0_35 = arith.constant 0 : index
      %39 = vector.load %arg6[%c0_34, %c0_35] : memref<1x256xf32, #tpu.memory_space<vmem>>, vector<1x256xf32>
      tpu.vector_store %arg6[%c0_34, %c0_35], %38 {strides = array<i32>} : memref<1x256xf32, #tpu.memory_space<vmem>>, vector<1x256xf32>,
      %cst_36 = arith.constant 0.000000e+00 : f32
      %40 = vector.broadcast %cst_36 : f32 to vector<1x256xf32>
      %c0_37 = arith.constant 0 : index
      %c0_38 = arith.constant 0 : index
      %41 = vector.load %arg7[%c0_37, %c0_38] : memref<1x256xf32, #tpu.memory_space<vmem>>, vector<1x256xf32>
      tpu.vector_store %arg7[%c0_37, %c0_38], %40 {strides = array<i32>} : memref<1x256xf32, #tpu.memory_space<vmem>>, vector<1x256xf32>,
      %cst_39 = arith.constant 0.000000e+00 : f32
      %42 = vector.broadcast %cst_39 : f32 to vector<1x256xf32>
      %c0_40 = arith.constant 0 : index
      %c0_41 = arith.constant 0 : index
      %43 = vector.load %arg8[%c0_40, %c0_41] : memref<1x256xf32, #tpu.memory_space<vmem>>, vector<1x256xf32>
      tpu.vector_store %arg8[%c0_40, %c0_41], %42 {strides = array<i32>} : memref<1x256xf32, #tpu.memory_space<vmem>>, vector<1x256xf32>,
      %cst_42 = arith.constant 0.000000e+00 : f32
      %44 = vector.broadcast %cst_42 : f32 to vector<1x256xf32>
      %c0_43 = arith.constant 0 : index
      %c0_44 = arith.constant 0 : index
      %45 = vector.load %arg9[%c0_43, %c0_44] : memref<1x256xf32, #tpu.memory_space<vmem>>, vector<1x256xf32>
      tpu.vector_store %arg9[%c0_43, %c0_44], %44 {strides = array<i32>} : memref<1x256xf32, #tpu.memory_space<vmem>>, vector<1x256xf32>,
    } else {
    }
    %c0 = arith.constant 0 : index
    %c0_1 = arith.constant 0 : index
    %3 = vector.load %arg2[%c0, %c0_1] : memref<16x256xf32, #tpu.memory_space<vmem>>, vector<16x256xf32>
    %c0_2 = arith.constant 0 : index
    %c0_3 = arith.constant 0 : index
    %4 = vector.load %arg3[%c0_2, %c0_3] : memref<16x256xf32, #tpu.memory_space<vmem>>, vector<16x256xf32>
    %c0_4 = arith.constant 0 : index
    %c0_5 = arith.constant 0 : index
    %5 = vector.load %arg5[%c0_4, %c0_5] : memref<1x256xf32, #tpu.memory_space<vmem>>, vector<1x256xf32>
    %cst = arith.constant dense<0.000000e+00> : vector<256xf32>
    %6 = vector.multi_reduction <add>, %3, %cst [0] : vector<16x256xf32> to vector<256xf32>
    %7 = vector.shape_cast %6 : vector<256xf32> to vector<1x256xf32>
    %8 = arith.addf %5, %7 : vector<1x256xf32>
    %c0_6 = arith.constant 0 : index
    %c0_7 = arith.constant 0 : index
    %9 = vector.load %arg5[%c0_6, %c0_7] : memref<1x256xf32, #tpu.memory_space<vmem>>, vector<1x256xf32>
    tpu.vector_store %arg5[%c0_6, %c0_7], %8 {strides = array<i32>} : memref<1x256xf32, #tpu.memory_space<vmem>>, vector<1x256xf32>,
    %c0_8 = arith.constant 0 : index
    %c0_9 = arith.constant 0 : index
    %10 = vector.load %arg6[%c0_8, %c0_9] : memref<1x256xf32, #tpu.memory_space<vmem>>, vector<1x256xf32>
    %cst_10 = arith.constant dense<0.000000e+00> : vector<256xf32>
    %11 = vector.multi_reduction <add>, %4, %cst_10 [0] : vector<16x256xf32> to vector<256xf32>
    %12 = vector.shape_cast %11 : vector<256xf32> to vector<1x256xf32>
    %13 = arith.addf %10, %12 : vector<1x256xf32>
    %c0_11 = arith.constant 0 : index
    %c0_12 = arith.constant 0 : index
    %14 = vector.load %arg6[%c0_11, %c0_12] : memref<1x256xf32, #tpu.memory_space<vmem>>, vector<1x256xf32>
    tpu.vector_store %arg6[%c0_11, %c0_12], %13 {strides = array<i32>} : memref<1x256xf32, #tpu.memory_space<vmem>>, vector<1x256xf32>,
    %c0_13 = arith.constant 0 : index
    %c0_14 = arith.constant 0 : index
    %15 = vector.load %arg7[%c0_13, %c0_14] : memref<1x256xf32, #tpu.memory_space<vmem>>, vector<1x256xf32>
    %16 = arith.mulf %3, %3 : vector<16x256xf32>
    %cst_15 = arith.constant dense<0.000000e+00> : vector<256xf32>
    %17 = vector.multi_reduction <add>, %16, %cst_15 [0] : vector<16x256xf32> to vector<256xf32>
    %18 = vector.shape_cast %17 : vector<256xf32> to vector<1x256xf32>
    %19 = arith.addf %15, %18 : vector<1x256xf32>
    %c0_16 = arith.constant 0 : index
    %c0_17 = arith.constant 0 : index
    %20 = vector.load %arg7[%c0_16, %c0_17] : memref<1x256xf32, #tpu.memory_space<vmem>>, vector<1x256xf32>
    tpu.vector_store %arg7[%c0_16, %c0_17], %19 {strides = array<i32>} : memref<1x256xf32, #tpu.memory_space<vmem>>, vector<1x256xf32>,
    %c0_18 = arith.constant 0 : index
    %c0_19 = arith.constant 0 : index
    %21 = vector.load %arg8[%c0_18, %c0_19] : memref<1x256xf32, #tpu.memory_space<vmem>>, vector<1x256xf32>
    %22 = arith.mulf %4, %4 : vector<16x256xf32>
    %cst_20 = arith.constant dense<0.000000e+00> : vector<256xf32>
    %23 = vector.multi_reduction <add>, %22, %cst_20 [0] : vector<16x256xf32> to vector<256xf32>
    %24 = vector.shape_cast %23 : vector<256xf32> to vector<1x256xf32>
    %25 = arith.addf %21, %24 : vector<1x256xf32>
    %c0_21 = arith.constant 0 : index
    %c0_22 = arith.constant 0 : index
    %26 = vector.load %arg8[%c0_21, %c0_22] : memref<1x256xf32, #tpu.memory_space<vmem>>, vector<1x256xf32>
    tpu.vector_store %arg8[%c0_21, %c0_22], %25 {strides = array<i32>} : memref<1x256xf32, #tpu.memory_space<vmem>>, vector<1x256xf32>,
    %c0_23 = arith.constant 0 : index
    %c0_24 = arith.constant 0 : index
    %27 = vector.load %arg9[%c0_23, %c0_24] : memref<1x256xf32, #tpu.memory_space<vmem>>, vector<1x256xf32>
    %28 = arith.mulf %3, %4 : vector<16x256xf32>
    %cst_25 = arith.constant dense<0.000000e+00> : vector<256xf32>
    %29 = vector.multi_reduction <add>, %28, %cst_25 [0] : vector<16x256xf32> to vector<256xf32>
    %30 = vector.shape_cast %29 : vector<256xf32> to vector<1x256xf32>
    %31 = arith.addf %27, %30 : vector<1x256xf32>
    %c0_26 = arith.constant 0 : index
    %c0_27 = arith.constant 0 : index
    %32 = vector.load %arg9[%c0_26, %c0_27] : memref<1x256xf32, #tpu.memory_space<vmem>>, vector<1x256xf32>
    tpu.vector_store %arg9[%c0_26, %c0_27], %31 {strides = array<i32>} : memref<1x256xf32, #tpu.memory_space<vmem>>, vector<1x256xf32>,
    %c0_i32_28 = arith.constant 0 : i32
    %33 = arith.cmpi eq, %arg1, %c0_i32_28 : i32
    %34 = arith.extui %33 : i1 to i32
    %c0_i32_29 = arith.constant 0 : i32
    %35 = arith.cmpi ne, %34, %c0_i32_29 : i32
    scf.if %35 {
      %c0_30 = arith.constant 0 : index
      %c0_31 = arith.constant 0 : index
      %36 = vector.load %arg5[%c0_30, %c0_31] : memref<1x256xf32, #tpu.memory_space<vmem>>, vector<1x256xf32>
      %cst_32 = arith.constant 0.0833333358 : f32
      %37 = vector.broadcast %cst_32 : f32 to vector<1x256xf32>
      %38 = arith.mulf %36, %37 : vector<1x256xf32>
      %c0_33 = arith.constant 0 : index
      %c0_34 = arith.constant 0 : index
      %39 = vector.load %arg6[%c0_33, %c0_34] : memref<1x256xf32, #tpu.memory_space<vmem>>, vector<1x256xf32>
      %cst_35 = arith.constant 0.0833333358 : f32
      %40 = vector.broadcast %cst_35 : f32 to vector<1x256xf32>
      %41 = arith.mulf %39, %40 : vector<1x256xf32>
      %c0_36 = arith.constant 0 : index
      %c0_37 = arith.constant 0 : index
      %42 = vector.load %arg7[%c0_36, %c0_37] : memref<1x256xf32, #tpu.memory_space<vmem>>, vector<1x256xf32>
      %cst_38 = arith.constant 0.0833333358 : f32
      %43 = vector.broadcast %cst_38 : f32 to vector<1x256xf32>
      %44 = arith.mulf %42, %43 : vector<1x256xf32>
      %45 = arith.mulf %38, %38 : vector<1x256xf32>
      %46 = arith.subf %44, %45 : vector<1x256xf32>
      %c0_39 = arith.constant 0 : index
      %c0_40 = arith.constant 0 : index
      %47 = vector.load %arg8[%c0_39, %c0_40] : memref<1x256xf32, #tpu.memory_space<vmem>>, vector<1x256xf32>
      %cst_41 = arith.constant 0.0833333358 : f32
      %48 = vector.broadcast %cst_41 : f32 to vector<1x256xf32>
      %49 = arith.mulf %47, %48 : vector<1x256xf32>
      %50 = arith.mulf %41, %41 : vector<1x256xf32>
      %51 = arith.subf %49, %50 : vector<1x256xf32>
      %c0_42 = arith.constant 0 : index
      %c0_43 = arith.constant 0 : index
      %52 = vector.load %arg9[%c0_42, %c0_43] : memref<1x256xf32, #tpu.memory_space<vmem>>, vector<1x256xf32>
      %cst_44 = arith.constant 0.0833333358 : f32
      %53 = vector.broadcast %cst_44 : f32 to vector<1x256xf32>
      %54 = arith.mulf %52, %53 : vector<1x256xf32>
      %55 = arith.mulf %38, %41 : vector<1x256xf32>
      %56 = arith.subf %54, %55 : vector<1x256xf32>
      %cst_45 = arith.constant 9.99999996E-13 : f32
      %57 = vector.broadcast %cst_45 : f32 to vector<1x256xf32>
      %58 = arith.addf %46, %57 : vector<1x256xf32>
      %cst_46 = arith.constant 9.99999996E-13 : f32
      %59 = vector.broadcast %cst_46 : f32 to vector<1x256xf32>
      %60 = arith.addf %51, %59 : vector<1x256xf32>
      %61 = arith.mulf %58, %60 : vector<1x256xf32>
      %62 = math.rsqrt %61 : vector<1x256xf32>
      %63 = arith.mulf %56, %62 : vector<1x256xf32>
      %c0_47 = arith.constant 0 : index
      %c0_48 = arith.constant 0 : index
      %64 = vector.load %arg4[%c0_47, %c0_48] : memref<1x256xf32, #tpu.memory_space<vmem>>, vector<1x256xf32>
      tpu.vector_store %arg4[%c0_47, %c0_48], %63 {strides = array<i32>} : memref<1x256xf32, #tpu.memory_space<vmem>>, vector<1x256xf32>,
    } else {
    }
    return
  }
  func.func @transform_0(%arg0: i32, %arg1: i32) -> (i32, i32) {
    %c0_i32 = arith.constant 0 : i32
    return %arg1, %arg0 : i32, i32
  }
  func.func @transform_1(%arg0: i32, %arg1: i32) -> (i32, i32) {
    %c0_i32 = arith.constant 0 : i32
    return %arg1, %arg0 : i32, i32
  }
  func.func @transform_2(%arg0: i32, %arg1: i32) -> (i32, i32) {
    %c0_i32 = arith.constant 0 : i32
    %c0_i32_0 = arith.constant 0 : i32
    return %c0_i32, %arg0 : i32, i32
  }
}

</mosaic_0001>

<bundles_post_ra>
// kernel: tpu_custom_call.1
= control target key start
LH: loop header
LB: loop body
LE: loop exit
PB: predicated region body
PF: predicated region fallthrough
CT: control target
= control target key end

     0   :  { %7 = vsyncpa [#allocation8], 0  ;;  %s439_s0 = inlined_call_operand.hbm [shape: f32[16,256], index: 0, kind: input, shape index: {}]   ;;  %s440_s1 = inlined_call_operand.hbm [shape: f32[16,256], index: 1, kind: input, shape index: {}]   ;;  %s441_s2 = inlined_call_operand.hbm [shape: f32[1,256], index: 2, kind: output, shape index: {}]  }
   0x1   :  { %8 = vsyncpa [#allocation11], 0 }
   0x2   :  { %9 = vsyncpa [#allocation9], 0  ;;  %s14_s11 = sshll.u32 %s439_s0, 4  ;;  %s330_s12 = smov [#allocation7]   ;;  %s15_s11 = int_to_ptr.hbm [resolvable:$true] %s14_s11 }
   0x3   :  { %s16_s13 = sshll.u32 %s330_s12, 4  ;;  %s27_s16 = sshll.u32 %s440_s1, 4  ;;  %s17_s13 = int_to_ptr.vmem [resolvable:$true] %s16_s13  ;;  %s28_s16 = int_to_ptr.hbm [resolvable:$true] %s27_s16 }
   0x4   :  { %s331_s17 = smov 256   ;;  %s332_s18 = smov 16  }
   0x5   :  { %22 = dma.hbm_to_vmem [thread:$0]  %s15_s11, 512, %s17_s13, [#allocation8], %s331_s17, %s331_s17, %s332_s18  }
   0x6   :  { %s333_s19 = smov [#allocation10]  }
   0x7   :  { %s29_s20 = sshll.u32 %s333_s19, 4  ;;  %s30_s20 = int_to_ptr.vmem [resolvable:$true] %s29_s20 }
   0x8   :  { %35 = dma.hbm_to_vmem [thread:$0]  %s28_s16, 512, %s30_s20, [#allocation11], %s331_s17, %s331_s17, %s332_s18  }
   0x9   :  { %324 = dma.done.wait [#allocation8], 512  }
   0xa   :  { %325 = vsyncadd [#allocation8], 4294966784 }
   0xb   :  { %326 = dma.done.wait [#allocation11], 512  }
   0xc   :  { %327 = vsyncadd [#allocation11], 4294966784  ;;  %v48_v0 = vlaneseq  ;;  %v334_v2 = vmov 0.0   ;;  %v371_v3 = vld [vmem:[#allocation7] sm:$0xff]  ;;  %v373_v4 = vld [vmem:[#allocation7 + $0x8] sm:$0xff]  ;;  %vm83_vm1 = vcmask 1040384  }
   0xd   :  { %v375_v5 = vld [vmem:[#allocation7 + $0x10] sm:$0xff]  ;;  %v377_v6 = vld [vmem:[#allocation7 + $0x18] sm:$0xff]  ;;  %v381_v8 = vld [vmem:[#allocation10] sm:$0xff]  ;;  %v115_v10 = vmul.f32 %v371_v3, %v371_v3  ;;  %v116_v11 = vmul.f32 %v373_v4, %v373_v4  ;;  %s335_s0 = smov [#allocation12]   ;;  %s233_s23 = sshll.u32 %s441_s2, 4  ;;  %s234_s23 = int_to_ptr.hbm [resolvable:$true] %s233_s23 }
   0xe   :  { %vm357_vm0 = vcmp.lt.s32.totalorder %v48_v0, 256  ;;  %v66_v7 = vadd.f32 %v375_v5, %v371_v3  ;;  %v383_v9 = vld [vmem:[#allocation10 + $0x8] sm:$0xff]  ;;  %v117_v12 = vmul.f32 %v375_v5, %v375_v5  ;;  %v73_v13 = vadd.f32 %v377_v6, %v373_v4  ;;  %v393_v14 = vld [vmem:[#allocation10 + $0x10] sm:$0xff]  ;;  %v395_v15 = vld [vmem:[#allocation10 + $0x18] sm:$0xff]  ;;  %s231_s1 = sshll.u32 %s335_s0, 4  ;;  %s232_s1 = int_to_ptr.vmem [resolvable:$true] %s231_s1 }
   0xf   :  { %52 = vst.msk [vmem:[#allocation2] sm:$0x3] %vm357_vm0, %v334_v2  ;;  %v118_v16 = vmul.f32 %v377_v6, %v377_v6  ;;  %v141_v17 = vmul.f32 %v381_v8, %v381_v8  ;;  %v142_v18 = vmul.f32 %v383_v9, %v383_v9  ;;  %v93_v20 = vadd.f32 %v393_v14, %v381_v8 }
  0x10   :  { %53 = vst.msk [vmem:[#allocation3] sm:$0x3] %vm357_vm0, %v334_v2  ;;  %v67_v19 = vrot.slane %v66_v7, 4  ;;  %v100_v21 = vadd.f32 %v395_v15, %v383_v9  ;;  %v119_v22 = vadd.f32 %v117_v12, %v115_v10  ;;  %v74_v23 = vrot.slane %v73_v13, 4 }
  0x11   :  { %54 = vst.msk [vmem:[#allocation4] sm:$0x3] %vm357_vm0, %v334_v2  ;;  %v126_v24 = vadd.f32 %v118_v16, %v116_v11  ;;  %v143_v25 = vmul.f32 %v393_v14, %v393_v14  ;;  %v144_v26 = vmul.f32 %v395_v15, %v395_v15  ;;  %v94_v28 = vrot.slane %v93_v20, 4 }
  0x12   :  { %55 = vst.msk [vmem:[#allocation5] sm:$0x3] %vm357_vm0, %v334_v2  ;;  %v68_v27 = vadd.f32 %v67_v19, %v66_v7  ;;  %v101_v29 = vrot.slane %v100_v21, 4  ;;  %v120_v30 = vrot.slane %v119_v22, 4  ;;  %v75_v31 = vadd.f32 %v74_v23, %v73_v13 }
  0x13   :  { %56 = vst.msk [vmem:[#allocation6] sm:$0x3] %vm357_vm0, %v334_v2  ;;  %v127_v32 = vrot.slane %v126_v24, 4  ;;  %v145_v33 = vadd.f32 %v143_v25, %v141_v17  ;;  %v152_v34 = vadd.f32 %v144_v26, %v142_v18  ;;  %v95_v36 = vadd.f32 %v94_v28, %v93_v20 }
  0x14   :  { %v69_v35 = vrot.slane %v68_v27, 2  ;;  %v102_v37 = vadd.f32 %v101_v29, %v100_v21  ;;  %v121_v38 = vadd.f32 %v120_v30, %v119_v22  ;;  %v76_v39 = vrot.slane %v75_v31, 2 }
  0x15   :  { %v128_v40 = vadd.f32 %v127_v32, %v126_v24  ;;  %v146_v41 = vrot.slane %v145_v33, 4  ;;  %v153_v42 = vrot.slane %v152_v34, 4  ;;  %v96_v44 = vrot.slane %v95_v36, 2 }
  0x16   :  { %v70_v43 = vadd.f32 %v69_v35, %v68_v27  ;;  %v103_v45 = vrot.slane %v102_v37, 2  ;;  %v122_v46 = vrot.slane %v121_v38, 2  ;;  %v77_v47 = vadd.f32 %v76_v39, %v75_v31  ;;  %v65_v16 = vld [vmem:[#allocation2] sm:$0x3] }
  0x17   :  { %v129_v48 = vrot.slane %v128_v40, 2  ;;  %v147_v49 = vadd.f32 %v146_v41, %v145_v33  ;;  %v154_v50 = vadd.f32 %v153_v42, %v152_v34  ;;  %v97_v52 = vadd.f32 %v96_v44, %v95_v36  ;;  %v92_v21 = vld [vmem:[#allocation3] sm:$0x3] }
  0x18   :  { %v71_v51 = vrot.slane %v70_v43, 1  ;;  %v104_v53 = vadd.f32 %v103_v45, %v102_v37  ;;  %v123_v54 = vadd.f32 %v122_v46, %v121_v38  ;;  %v78_v55 = vrot.slane %v77_v47, 1  ;;  %v114_v27 = vld [vmem:[#allocation4] sm:$0x3] }
  0x19   :  { %v130_v56 = vadd.f32 %v129_v48, %v128_v40  ;;  %v148_v57 = vrot.slane %v147_v49, 2  ;;  %v155_v58 = vrot.slane %v154_v50, 2  ;;  %v98_v60 = vrot.slane %v97_v52, 1 }
  0x1a   :  { %v72_v59 = vadd.f32 %v71_v51, %v70_v43  ;;  %v105_v61 = vrot.slane %v104_v53, 1  ;;  %v124_v62 = vrot.slane %v123_v54, 1  ;;  %v79_v63 = vadd.f32 %v78_v55, %v77_v47  ;;  %v166_v55 = vld [vmem:[#allocation6] sm:$0x3] }
  0x1b   :  { %v131_v0 = vrot.slane %v130_v56, 1  ;;  %v149_v2 = vadd.f32 %v148_v57, %v147_v49  ;;  %v156_v7 = vadd.f32 %v155_v58, %v154_v50  ;;  %v99_v10 = vadd.f32 %v98_v60, %v97_v52 }
  0x1c   :  { %v106_v11 = vadd.f32 %v105_v61, %v104_v53  ;;  %v125_v12 = vadd.f32 %v124_v62, %v123_v54  ;;  %v167_v13 = vmul.f32 %v381_v8, %v371_v3  ;;  %v82_v17 = vrot.slane %v79_v63, 7 }
  0x1d   :  { %v132_v18 = vadd.f32 %v131_v0, %v130_v56  ;;  %v150_v19 = vrot.slane %v149_v2, 1  ;;  %v157_v20 = vrot.slane %v156_v7, 1  ;;  %v168_v23 = vmul.f32 %v383_v9, %v373_v4  ;;  %v140_v9 = vld [vmem:[#allocation5] sm:$0x3] }
  0x1e   :  { %v109_v22 = vrot.slane %v106_v11, 7  ;;  %v169_v24 = vmul.f32 %v393_v14, %v375_v5  ;;  %v170_v25 = vmul.f32 %v395_v15, %v377_v6  ;;  %v84_v26 = vsel %vm83_vm1, %v72_v59, %v82_v17 }
  0x1f   :  { %v135_v3 = vrot.slane %v132_v18, 7  ;;  %v151_v8 = vadd.f32 %v150_v19, %v149_v2  ;;  %v158_v28 = vadd.f32 %v157_v20, %v156_v7  ;;  %v86_v29 = vadd.f32 %v84_v26, %v65_v16 }
  0x20   :  { %v110_v30 = vsel %vm83_vm1, %v99_v10, %v109_v22  ;;  %v171_v31 = vadd.f32 %v169_v24, %v167_v13  ;;  %v178_v32 = vadd.f32 %v170_v25, %v168_v23 }
  0x21   :  { %v112_v33 = vadd.f32 %v110_v30, %v92_v21  ;;  %v136_v4 = vsel %vm83_vm1, %v125_v12, %v135_v3  ;;  %v161_v34 = vrot.slane %v158_v28, 7  ;;  %91 = vst.msk [vmem:[#allocation2] sm:$0x3] %vm357_vm0, %v86_v29 }
  0x22   :  { %v138_v5 = vadd.f32 %v136_v4, %v114_v27  ;;  %v172_v6 = vrot.slane %v171_v31, 4  ;;  %v179_v14 = vrot.slane %v178_v32, 4 }
  0x23   :  { %113 = vst.msk [vmem:[#allocation3] sm:$0x3] %vm357_vm0, %v112_v33  ;;  %v162_v15 = vsel %vm83_vm1, %v151_v8, %v161_v34 }
  0x24   :  { %139 = vst.msk [vmem:[#allocation4] sm:$0x3] %vm357_vm0, %v138_v5  ;;  %v164_v35 = vadd.f32 %v162_v15, %v140_v9  ;;  %v173_v36 = vadd.f32 %v172_v6, %v171_v31  ;;  %v180_v37 = vadd.f32 %v179_v14, %v178_v32 }
  0x26   :  { %165 = vst.msk [vmem:[#allocation5] sm:$0x3] %vm357_vm0, %v164_v35  ;;  %v174_v38 = vrot.slane %v173_v36, 2  ;;  %v181_v39 = vrot.slane %v180_v37, 2 }
  0x28   :  { %v175_v40 = vadd.f32 %v174_v38, %v173_v36  ;;  %v182_v41 = vadd.f32 %v181_v39, %v180_v37  ;;  %v195_v42 = vld [vmem:[#allocation2] sm:$0x3] }
  0x29   :  { %v196_v45 = vmul.f32 0.083333336, %v195_v42 }
  0x2a   :  { %v176_v43 = vrot.slane %v175_v40, 1  ;;  %v183_v44 = vrot.slane %v182_v41, 1  ;;  %v197_v46 = vld [vmem:[#allocation3] sm:$0x3] }
  0x2b   :  { %v198_v47 = vmul.f32 0.083333336, %v197_v46  ;;  %v199_v48 = vld [vmem:[#allocation4] sm:$0x3]  ;;  %v201_v52 = vmul.f32 %v196_v45, %v196_v45 }
  0x2c   :  { %v177_v49 = vadd.f32 %v176_v43, %v175_v40  ;;  %v184_v50 = vadd.f32 %v183_v44, %v182_v41  ;;  %v200_v51 = vmul.f32 0.083333336, %v199_v48 }
  0x2d   :  { %v203_v53 = vld [vmem:[#allocation5] sm:$0x3]  ;;  %v205_v54 = vmul.f32 %v198_v47, %v198_v47  ;;  %v209_v16 = vmul.f32 %v198_v47, %v196_v45 }
  0x2e   :  { %v187_v56 = vrot.slane %v184_v50, 7  ;;  %v202_v57 = vsub.f32 %v200_v51, %v201_v52  ;;  %v204_v58 = vmul.f32 0.083333336, %v203_v53 }
  0x30   :  { %v188_v59 = vsel %vm83_vm1, %v177_v49, %v187_v56  ;;  %v206_v60 = vsub.f32 %v204_v58, %v205_v54  ;;  %v211_v61 = vadd.f32 1e-12, %v202_v57 }
  0x31   :  { %v190_v62 = vadd.f32 %v188_v59, %v166_v55 }
  0x32   :  { %v212_v63 = vadd.f32 1e-12, %v206_v60 }
  0x33   :  { %191 = vst.msk [vmem:[#allocation6] sm:$0x3] %vm357_vm0, %v190_v62 }
  0x34   :  { %v213_v0 = vmul.f32 %v212_v63, %v211_v61 }
  0x36   :  { %250 = vrsqrt.f32 %v213_v0  ;;  %vm220_vm3 = vweird.f32 %v213_v0 }
  0x3a   :  { %v207_v10 = vld [vmem:[#allocation6] sm:$0x3] }
  0x3b   :  { %v208_v13 = vmul.f32 0.083333336, %v207_v10 }
  0x3c   :  { %v251_v2 = vpop.eup %250 }
  0x3d   :  { %v215_v7 = vmul.f32 %v251_v2, %v213_v0  ;;  %vm221_vm2 = vweird.f32 %v251_v2  ;;  %v210_v19 = vsub.f32 %v208_v13, %v209_v16 }
  0x3e   :  { %vm222_vm4 = vmor %vm220_vm3, %vm221_vm2 }
  0x3f   :  { %v216_v11 = vmul.f32 %v251_v2, %v215_v7 }
  0x41   :  { %v217_v12 = vmul.f32 0.5, %v216_v11 }
  0x43   :  { %v218_v17 = vsub.f32 1.5, %v217_v12 }
  0x45   :  { %v219_v18 = vmul.f32 %v251_v2, %v218_v17 }
  0x47   :  { %v223_v20 = vsel %vm222_vm4, %v251_v2, %v219_v18 }
  0x48   :  { %v224_v21 = vmul.f32 %v223_v20, %v210_v19 }
  0x4a   :  { %225 = vst.msk [vmem:[#allocation12] sm:$0x3] %vm357_vm0, %v224_v21 }
  0x4b   :  { %236 = dma.vmem_to_hbm [thread:$0]  %s232_s1, 32, %s234_s23, [#allocation9]  }
  0x4c   :  { %328 = dma.done.wait [#allocation9], 32  }
  0x4d   :  { %329 = vsyncadd [#allocation9], 4294967264 }
  0x4e   :  { %241 = vsyncpa [#allocation8], 1 }
  0x4f   :  { %242 = vsyncpa [#allocation11], 1 }
  0x50   :  { %243 = vsyncpa [#allocation9], 1 }

</bundles_post_ra>
